<compile_context>
chip_gen: v7x
topology: tpu7x:2x2x1
jax: 0.10.0
libtpu: 0.0.40
codegen_flags: <defaults>
</compile_context>

<pallas_src>
import functools

import jax
import jax.numpy as jnp
from jax.experimental import pallas as pl
from jax.experimental.pallas import tpu as pltpu

INPUT_DIM = 32
LATENT_DIM = 10
OUTPUT_DIM = 1
NUM_SAMPLES = 10          # the hard-coded "for i in range(10)" loop in forward()
PACK_W = 128              # lane-dense packed output width (one full lane tile)

# packed output layout: [ mu (10) | logvar (10) | x_hat (1) | zero pad ]
_MU_LO, _MU_HI = 0, LATENT_DIM
_LV_LO, _LV_HI = LATENT_DIM, 2 * LATENT_DIM
_XH_LO, _XH_HI = 2 * LATENT_DIM, 2 * LATENT_DIM + OUTPUT_DIM


def _relu(x):
    return jnp.maximum(x, 0.0)


def _round_up(n, m):
    return ((n + m - 1) // m) * m


def vae_kernel(
    x_ref,                                                   # (TB, INPUT_DIM)
    ew1_ref, eb1_ref, ew2_ref, eb2_ref, ew3_ref, eb3_ref,    # encoder params
    dw1_ref, db1_ref, dw2_ref, db2_ref, dw3_ref, db3_ref,    # decoder params
    eps_ref,                                                 # (NUM_SAMPLES, TB, LATENT)
    out_ref,                                                 # (TB, PACK_W) packed output
):
    tb = x_ref.shape[0]
    x = x_ref[...]

    # ---- encoder: Linear(in,128) -> ReLU -> Linear(128,64) -> ReLU -> Linear(64, 2*latent)
    h = _relu(jnp.dot(x, ew1_ref[...], preferred_element_type=jnp.float32) + eb1_ref[...])
    h = _relu(jnp.dot(h, ew2_ref[...], preferred_element_type=jnp.float32) + eb2_ref[...])
    enc = jnp.dot(h, ew3_ref[...], preferred_element_type=jnp.float32) + eb3_ref[...]

    mu = enc[:, :LATENT_DIM]
    logvar = enc[:, LATENT_DIM:]
    std = jnp.exp(0.5 * logvar)

    # ---- reparameterize: all NUM_SAMPLES at once, stacked into the M dimension
    eps = eps_ref[...]                                        # (NS, TB, L)
    z = (mu[None, :, :] + eps * std[None, :, :]).reshape(NUM_SAMPLES * tb, LATENT_DIM)

    # ---- decoder hidden layers, single pass over all samples (M = NS*TB)
    d = _relu(jnp.dot(z, dw1_ref[...], preferred_element_type=jnp.float32) + db1_ref[...])
    d = _relu(jnp.dot(d, dw2_ref[...], preferred_element_type=jnp.float32) + db2_ref[...])

    # ---- sum over samples, then one hoisted final matmul (last layer is affine):
    #      mean_i(d_i @ W3 + b3) = (sum_i d_i) @ W3 / NS + b3
    d_sum = jnp.sum(d.reshape(NUM_SAMPLES, tb, d.shape[-1]), axis=0)   # (TB, 128)
    x_hat = (jnp.dot(d_sum, dw3_ref[...], preferred_element_type=jnp.float32)
             * (1.0 / NUM_SAMPLES) + db3_ref[...])                      # (TB, 1)

    # ---- single lane-dense store: [mu | logvar | x_hat | pad] -> (TB, 128)
    pad = jnp.zeros((tb, PACK_W - _XH_HI), dtype=jnp.float32)
    out_ref[...] = jnp.concatenate([enc, x_hat, pad], axis=-1)


def init_params(key, input_dim=INPUT_DIM, latent_dim=LATENT_DIM, output_dim=OUTPUT_DIM):
    """Deterministic PyTorch-style init: U(-1/sqrt(fan_in), 1/sqrt(fan_in))."""
    dims = [
        (input_dim, 128), (128, 64), (64, 2 * latent_dim),   # encoder
        (latent_dim, 64), (64, 128), (128, output_dim),      # decoder
    ]
    params = []
    for (fan_in, fan_out) in dims:
        key, kw, kb = jax.random.split(key, 3)
        bound = 1.0 / (fan_in ** 0.5)
        w = jax.random.uniform(kw, (fan_in, fan_out), jnp.float32, -bound, bound)
        b = jax.random.uniform(kb, (1, fan_out), jnp.float32, -bound, bound)
        params += [w, b]
    return params


@functools.partial(jax.jit, static_argnames=("block_b",))
def vae_forward(x, params, eps, block_b=256):
    batch = x.shape[0]
    tb = min(block_b, _round_up(batch, 8))        # batch tile, multiple of 8 sublanes
    bp = _round_up(batch, tb)                     # padded batch
    if bp != batch:
        x = jnp.pad(x, ((0, bp - batch), (0, 0)))
        eps = jnp.pad(eps, ((0, 0), (0, bp - batch), (0, 0)))
    grid = (bp // tb,)

    def _full_spec(shape):
        return pl.BlockSpec(shape, lambda i, _s=shape: (0,) * len(_s))

    in_specs = [pl.BlockSpec((tb, INPUT_DIM), lambda i: (i, 0))]          # x tiled on batch
    in_specs += [_full_spec(p.shape) for p in params]                     # weights resident
    in_specs.append(pl.BlockSpec((NUM_SAMPLES, tb, LATENT_DIM),
                                 lambda i: (0, i, 0)))                    # eps tiled on batch
    out_specs = pl.BlockSpec((tb, PACK_W), lambda i: (i, 0))              # packed output

    packed = pl.pallas_call(
        vae_kernel,
        out_shape=jax.ShapeDtypeStruct((bp, PACK_W), jnp.float32),
        grid_spec=pltpu.PrefetchScalarGridSpec(
            num_scalar_prefetch=0,
            grid=grid,
            in_specs=in_specs,
            out_specs=out_specs,
        ),
        compiler_params=pltpu.CompilerParams(
            dimension_semantics=("parallel",),          # shard batch tiles across TCs (v7x)
            vmem_limit_bytes=32 * 1024 * 1024,          # explicit, safe on v7x's 64 MiB VMEM
        ),
    )(x, *params, eps)

    mu = packed[:batch, _MU_LO:_MU_HI]
    logvar = packed[:batch, _LV_LO:_LV_HI]
    x_hat = packed[:batch, _XH_LO:_XH_HI]
    return x_hat, mu, logvar


def vae_reference(x, params, eps):
    """Pure-JAX reference matching the PyTorch module semantics."""
    ew1, eb1, ew2, eb2, ew3, eb3, dw1, db1, dw2, db2, dw3, db3 = params
    h = jnp.maximum(x @ ew1 + eb1, 0.0)
    h = jnp.maximum(h @ ew2 + eb2, 0.0)
    enc = h @ ew3 + eb3
    mu, logvar = enc[:, :LATENT_DIM], enc[:, LATENT_DIM:]
    std = jnp.exp(0.5 * logvar)
    acc = 0.0
    for i in range(NUM_SAMPLES):
        z = mu + eps[i] * std
        d = jnp.maximum(z @ dw1 + db1, 0.0)
        d = jnp.maximum(d @ dw2 + db2, 0.0)
        acc = acc + (d @ dw3 + db3)
    return acc / NUM_SAMPLES, mu, logvar


if __name__ == "__main__":
    key = jax.random.PRNGKey(0)
    k_param, k_x, k_eps = jax.random.split(key, 3)

    batch = 8
    params = init_params(k_param)
    x = jax.random.normal(k_x, (batch, INPUT_DIM), dtype=jnp.float32)
    # TODO(synk): torch.randn_like inside forward() is replaced by deterministic
    # host-drawn normals passed in as an input (no in-kernel RNG).
    eps = jax.random.normal(k_eps, (NUM_SAMPLES, batch, LATENT_DIM), dtype=jnp.float32)

    x_hat, mu, logvar = vae_forward(x, params, eps)
    jax.block_until_ready((x_hat, mu, logvar))

    ref_xhat, ref_mu, ref_logvar = vae_reference(x, params, eps)
    assert jnp.allclose(x_hat, ref_xhat, atol=1e-4), "x_hat mismatch"
    assert jnp.allclose(mu, ref_mu, atol=1e-4), "mu mismatch"
    assert jnp.allclose(logvar, ref_logvar, atol=1e-4), "logvar mismatch"

    print("KERNEL_OK")
</pallas_src>

<mosaic_0001>
module attributes {stable_mosaic.version = 11 : i64} {
  func.func @vae_kernel(%arg0: i32, %arg1: memref<8x32xf32, #tpu.memory_space<vmem>>, %arg2: memref<32x128xf32, #tpu.memory_space<vmem>>, %arg3: memref<1x128xf32, #tpu.memory_space<vmem>>, %arg4: memref<128x64xf32, #tpu.memory_space<vmem>>, %arg5: memref<1x64xf32, #tpu.memory_space<vmem>>, %arg6: memref<64x20xf32, #tpu.memory_space<vmem>>, %arg7: memref<1x20xf32, #tpu.memory_space<vmem>>, %arg8: memref<10x64xf32, #tpu.memory_space<vmem>>, %arg9: memref<1x64xf32, #tpu.memory_space<vmem>>, %arg10: memref<64x128xf32, #tpu.memory_space<vmem>>, %arg11: memref<1x128xf32, #tpu.memory_space<vmem>>, %arg12: memref<128x1xf32, #tpu.memory_space<vmem>>, %arg13: memref<1x1xf32, #tpu.memory_space<vmem>>, %arg14: memref<10x8x10xf32, #tpu.memory_space<vmem>>, %arg15: memref<8x128xf32, #tpu.memory_space<vmem>>) attributes {dimension_semantics = [#tpu.dimension_semantics<parallel>], iteration_bounds = array<i64: 1>, scalar_prefetch = 0 : i64, scratch_operands = 0 : i64, tpu.core_type = #tpu.core_type<tc>, window_params = [{transform_indices = @transform_0, window_bounds = array<i64: 8, 32>}, {pipeline_mode = #tpu.pipeline_mode<synchronous>, transform_indices = @transform_1, window_bounds = array<i64: 32, 128>}, {pipeline_mode = #tpu.pipeline_mode<synchronous>, transform_indices = @transform_2, window_bounds = array<i64: 1, 128>}, {pipeline_mode = #tpu.pipeline_mode<synchronous>, transform_indices = @transform_3, window_bounds = array<i64: 128, 64>}, {pipeline_mode = #tpu.pipeline_mode<synchronous>, transform_indices = @transform_4, window_bounds = array<i64: 1, 64>}, {pipeline_mode = #tpu.pipeline_mode<synchronous>, transform_indices = @transform_5, window_bounds = array<i64: 64, 20>}, {pipeline_mode = #tpu.pipeline_mode<synchronous>, transform_indices = @transform_6, window_bounds = array<i64: 1, 20>}, {pipeline_mode = #tpu.pipeline_mode<synchronous>, transform_indices = @transform_7, window_bounds = array<i64: 10, 64>}, {pipeline_mode = #tpu.pipeline_mode<synchronous>, transform_indices = @transform_8, window_bounds = array<i64: 1, 64>}, {pipeline_mode = #tpu.pipeline_mode<synchronous>, transform_indices = @transform_9, window_bounds = array<i64: 64, 128>}, {pipeline_mode = #tpu.pipeline_mode<synchronous>, transform_indices = @transform_10, window_bounds = array<i64: 1, 128>}, {pipeline_mode = #tpu.pipeline_mode<synchronous>, transform_indices = @transform_11, window_bounds = array<i64: 128, 1>}, {pipeline_mode = #tpu.pipeline_mode<synchronous>, transform_indices = @transform_12, window_bounds = array<i64: 1, 1>}, {transform_indices = @transform_13, window_bounds = array<i64: 10, 8, 10>}, {transform_indices = @transform_14, window_bounds = array<i64: 8, 128>}]} {
    %c0 = arith.constant 0 : index
    %c0_0 = arith.constant 0 : index
    %0 = vector.load %arg1[%c0, %c0_0] : memref<8x32xf32, #tpu.memory_space<vmem>>, vector<8x32xf32>
    %c0_1 = arith.constant 0 : index
    %c0_2 = arith.constant 0 : index
    %1 = vector.load %arg2[%c0_1, %c0_2] : memref<32x128xf32, #tpu.memory_space<vmem>>, vector<32x128xf32>
    %cst = arith.constant dense<0.000000e+00> : vector<8x128xf32>
    %2 = tpu.matmul %0, %1, %cst {dimension_numbers = #tpu.dot_dimension_numbers<[1], [0], [0], [1], [0, 0, 1, 1], [], []>} : vector<8x32xf32>, vector<32x128xf32>, vector<8x128xf32> -> vector<8x128xf32>
    %c0_3 = arith.constant 0 : index
    %c0_4 = arith.constant 0 : index
    %3 = vector.load %arg3[%c0_3, %c0_4] : memref<1x128xf32, #tpu.memory_space<vmem>>, vector<1x128xf32>
    %4 = vector.broadcast %3 : vector<1x128xf32> to vector<8x128xf32>
    %5 = arith.addf %2, %4 : vector<8x128xf32>
    %cst_5 = arith.constant 0.000000e+00 : f32
    %6 = vector.broadcast %cst_5 : f32 to vector<8x128xf32>
    %7 = arith.maximumf %5, %6 : vector<8x128xf32>
    %c0_6 = arith.constant 0 : index
    %c0_7 = arith.constant 0 : index
    %8 = vector.load %arg4[%c0_6, %c0_7] : memref<128x64xf32, #tpu.memory_space<vmem>>, vector<128x64xf32>
    %cst_8 = arith.constant dense<0.000000e+00> : vector<8x64xf32>
    %9 = tpu.matmul %7, %8, %cst_8 {dimension_numbers = #tpu.dot_dimension_numbers<[1], [0], [0], [1], [0, 0, 1, 1], [], []>} : vector<8x128xf32>, vector<128x64xf32>, vector<8x64xf32> -> vector<8x64xf32>
    %c0_9 = arith.constant 0 : index
    %c0_10 = arith.constant 0 : index
    %10 = vector.load %arg5[%c0_9, %c0_10] : memref<1x64xf32, #tpu.memory_space<vmem>>, vector<1x64xf32>
    %11 = vector.broadcast %10 : vector<1x64xf32> to vector<8x64xf32>
    %12 = arith.addf %9, %11 : vector<8x64xf32>
    %cst_11 = arith.constant 0.000000e+00 : f32
    %13 = vector.broadcast %cst_11 : f32 to vector<8x64xf32>
    %14 = arith.maximumf %12, %13 : vector<8x64xf32>
    %c0_12 = arith.constant 0 : index
    %c0_13 = arith.constant 0 : index
    %15 = vector.load %arg6[%c0_12, %c0_13] : memref<64x20xf32, #tpu.memory_space<vmem>>, vector<64x20xf32>
    %cst_14 = arith.constant dense<0.000000e+00> : vector<8x20xf32>
    %16 = tpu.matmul %14, %15, %cst_14 {dimension_numbers = #tpu.dot_dimension_numbers<[1], [0], [0], [1], [0, 0, 1, 1], [], []>} : vector<8x64xf32>, vector<64x20xf32>, vector<8x20xf32> -> vector<8x20xf32>
    %c0_15 = arith.constant 0 : index
    %c0_16 = arith.constant 0 : index
    %17 = vector.load %arg7[%c0_15, %c0_16] : memref<1x20xf32, #tpu.memory_space<vmem>>, vector<1x20xf32>
    %18 = vector.broadcast %17 : vector<1x20xf32> to vector<8x20xf32>
    %19 = arith.addf %16, %18 : vector<8x20xf32>
    %20 = vector.extract_strided_slice %19 {offsets = [0, 0], sizes = [8, 10], strides = [1, 1]} : vector<8x20xf32> to vector<8x10xf32>
    %21 = vector.extract_strided_slice %19 {offsets = [0, 10], sizes = [8, 10], strides = [1, 1]} : vector<8x20xf32> to vector<8x10xf32>
    %cst_17 = arith.constant 5.000000e-01 : f32
    %22 = vector.broadcast %cst_17 : f32 to vector<8x10xf32>
    %23 = arith.mulf %22, %21 : vector<8x10xf32>
    %24 = math.exp %23 : vector<8x10xf32>
    %c0_18 = arith.constant 0 : index
    %c0_19 = arith.constant 0 : index
    %c0_20 = arith.constant 0 : index
    %25 = vector.load %arg14[%c0_18, %c0_19, %c0_20] : memref<10x8x10xf32, #tpu.memory_space<vmem>>, vector<10x8x10xf32>
    %26 = vector.shape_cast %20 : vector<8x10xf32> to vector<1x8x10xf32>
    %27 = vector.shape_cast %24 : vector<8x10xf32> to vector<1x8x10xf32>
    %28 = vector.broadcast %27 : vector<1x8x10xf32> to vector<10x8x10xf32>
    %29 = arith.mulf %25, %28 : vector<10x8x10xf32>
    %30 = vector.broadcast %26 : vector<1x8x10xf32> to vector<10x8x10xf32>
    %31 = arith.addf %30, %29 : vector<10x8x10xf32>
    %32 = vector.shape_cast %31 : vector<10x8x10xf32> to vector<80x10xf32>
    %c0_21 = arith.constant 0 : index
    %c0_22 = arith.constant 0 : index
    %33 = vector.load %arg8[%c0_21, %c0_22] : memref<10x64xf32, #tpu.memory_space<vmem>>, vector<10x64xf32>
    %cst_23 = arith.constant dense<0.000000e+00> : vector<80x64xf32>
    %34 = tpu.matmul %32, %33, %cst_23 {dimension_numbers = #tpu.dot_dimension_numbers<[1], [0], [0], [1], [0, 0, 1, 1], [], []>} : vector<80x10xf32>, vector<10x64xf32>, vector<80x64xf32> -> vector<80x64xf32>
    %c0_24 = arith.constant 0 : index
    %c0_25 = arith.constant 0 : index
    %35 = vector.load %arg9[%c0_24, %c0_25] : memref<1x64xf32, #tpu.memory_space<vmem>>, vector<1x64xf32>
    %36 = vector.broadcast %35 : vector<1x64xf32> to vector<80x64xf32>
    %37 = arith.addf %34, %36 : vector<80x64xf32>
    %cst_26 = arith.constant 0.000000e+00 : f32
    %38 = vector.broadcast %cst_26 : f32 to vector<80x64xf32>
    %39 = arith.maximumf %37, %38 : vector<80x64xf32>
    %c0_27 = arith.constant 0 : index
    %c0_28 = arith.constant 0 : index
    %40 = vector.load %arg10[%c0_27, %c0_28] : memref<64x128xf32, #tpu.memory_space<vmem>>, vector<64x128xf32>
    %cst_29 = arith.constant dense<0.000000e+00> : vector<80x128xf32>
    %41 = tpu.matmul %39, %40, %cst_29 {dimension_numbers = #tpu.dot_dimension_numbers<[1], [0], [0], [1], [0, 0, 1, 1], [], []>} : vector<80x64xf32>, vector<64x128xf32>, vector<80x128xf32> -> vector<80x128xf32>
    %c0_30 = arith.constant 0 : index
    %c0_31 = arith.constant 0 : index
    %42 = vector.load %arg11[%c0_30, %c0_31] : memref<1x128xf32, #tpu.memory_space<vmem>>, vector<1x128xf32>
    %43 = vector.broadcast %42 : vector<1x128xf32> to vector<80x128xf32>
    %44 = arith.addf %41, %43 : vector<80x128xf32>
    %cst_32 = arith.constant 0.000000e+00 : f32
    %45 = vector.broadcast %cst_32 : f32 to vector<80x128xf32>
    %46 = arith.maximumf %44, %45 : vector<80x128xf32>
    %47 = vector.shape_cast %46 : vector<80x128xf32> to vector<10x8x128xf32>
    %cst_33 = arith.constant dense<0.000000e+00> : vector<8x128xf32>
    %48 = vector.multi_reduction <add>, %47, %cst_33 [0] : vector<10x8x128xf32> to vector<8x128xf32>
    %c0_34 = arith.constant 0 : index
    %c0_35 = arith.constant 0 : index
    %49 = vector.load %arg12[%c0_34, %c0_35] : memref<128x1xf32, #tpu.memory_space<vmem>>, vector<128x1xf32>
    %cst_36 = arith.constant dense<0.000000e+00> : vector<8x1xf32>
    %50 = tpu.matmul %48, %49, %cst_36 {dimension_numbers = #tpu.dot_dimension_numbers<[1], [0], [0], [1], [0, 0, 1, 1], [], []>} : vector<8x128xf32>, vector<128x1xf32>, vector<8x1xf32> -> vector<8x1xf32>
    %cst_37 = arith.constant 1.000000e-01 : f32
    %51 = vector.broadcast %cst_37 : f32 to vector<8x1xf32>
    %52 = arith.mulf %50, %51 : vector<8x1xf32>
    %c0_38 = arith.constant 0 : index
    %c0_39 = arith.constant 0 : index
    %53 = vector.load %arg13[%c0_38, %c0_39] : memref<1x1xf32, #tpu.memory_space<vmem>>, vector<1x1xf32>
    %54 = vector.broadcast %53 : vector<1x1xf32> to vector<8x1xf32>
    %55 = arith.addf %52, %54 : vector<8x1xf32>
    %cst_40 = arith.constant 0.000000e+00 : f32
    %56 = vector.broadcast %cst_40 : f32 to vector<8x107xf32>
    %57 = tpu.concatenate %19, %55, %56 in 1 : vector<8x20xf32>, vector<8x1xf32>, vector<8x107xf32> -> vector<8x128xf32>
    %c0_41 = arith.constant 0 : index
    %c0_42 = arith.constant 0 : index
    %58 = vector.load %arg15[%c0_41, %c0_42] : memref<8x128xf32, #tpu.memory_space<vmem>>, vector<8x128xf32>
    tpu.vector_store %arg15[%c0_41, %c0_42], %57 {strides = array<i32>} : memref<8x128xf32, #tpu.memory_space<vmem>>, vector<8x128xf32>,
    return
  }
  func.func @transform_0(%arg0: i32) -> (i32, i32) {
    %c0_i32 = arith.constant 0 : i32
    %c0_i32_0 = arith.constant 0 : i32
    return %arg0, %c0_i32 : i32, i32
  }
  func.func @transform_1(%arg0: i32) -> (i32, i32) {
    %c0_i32 = arith.constant 0 : i32
    %c0_i32_0 = arith.constant 0 : i32
    %c0_i32_1 = arith.constant 0 : i32
    return %c0_i32, %c0_i32_0 : i32, i32
  }
  func.func @transform_2(%arg0: i32) -> (i32, i32) {
    %c0_i32 = arith.constant 0 : i32
    %c0_i32_0 = arith.constant 0 : i32
    %c0_i32_1 = arith.constant 0 : i32
    return %c0_i32, %c0_i32_0 : i32, i32
  }
  func.func @transform_3(%arg0: i32) -> (i32, i32) {
    %c0_i32 = arith.constant 0 : i32
    %c0_i32_0 = arith.constant 0 : i32
    %c0_i32_1 = arith.constant 0 : i32
    return %c0_i32, %c0_i32_0 : i32, i32
  }
  func.func @transform_4(%arg0: i32) -> (i32, i32) {
    %c0_i32 = arith.constant 0 : i32
    %c0_i32_0 = arith.constant 0 : i32
    %c0_i32_1 = arith.constant 0 : i32
    return %c0_i32, %c0_i32_0 : i32, i32
  }
  func.func @transform_5(%arg0: i32) -> (i32, i32) {
    %c0_i32 = arith.constant 0 : i32
    %c0_i32_0 = arith.constant 0 : i32
    %c0_i32_1 = arith.constant 0 : i32
    return %c0_i32, %c0_i32_0 : i32, i32
  }
  func.func @transform_6(%arg0: i32) -> (i32, i32) {
    %c0_i32 = arith.constant 0 : i32
    %c0_i32_0 = arith.constant 0 : i32
    %c0_i32_1 = arith.constant 0 : i32
    return %c0_i32, %c0_i32_0 : i32, i32
  }
  func.func @transform_7(%arg0: i32) -> (i32, i32) {
    %c0_i32 = arith.constant 0 : i32
    %c0_i32_0 = arith.constant 0 : i32
    %c0_i32_1 = arith.constant 0 : i32
    return %c0_i32, %c0_i32_0 : i32, i32
  }
  func.func @transform_8(%arg0: i32) -> (i32, i32) {
    %c0_i32 = arith.constant 0 : i32
    %c0_i32_0 = arith.constant 0 : i32
    %c0_i32_1 = arith.constant 0 : i32
    return %c0_i32, %c0_i32_0 : i32, i32
  }
  func.func @transform_9(%arg0: i32) -> (i32, i32) {
    %c0_i32 = arith.constant 0 : i32
    %c0_i32_0 = arith.constant 0 : i32
    %c0_i32_1 = arith.constant 0 : i32
    return %c0_i32, %c0_i32_0 : i32, i32
  }
  func.func @transform_10(%arg0: i32) -> (i32, i32) {
    %c0_i32 = arith.constant 0 : i32
    %c0_i32_0 = arith.constant 0 : i32
    %c0_i32_1 = arith.constant 0 : i32
    return %c0_i32, %c0_i32_0 : i32, i32
  }
  func.func @transform_11(%arg0: i32) -> (i32, i32) {
    %c0_i32 = arith.constant 0 : i32
    %c0_i32_0 = arith.constant 0 : i32
    %c0_i32_1 = arith.constant 0 : i32
    return %c0_i32, %c0_i32_0 : i32, i32
  }
  func.func @transform_12(%arg0: i32) -> (i32, i32) {
    %c0_i32 = arith.constant 0 : i32
    %c0_i32_0 = arith.constant 0 : i32
    %c0_i32_1 = arith.constant 0 : i32
    return %c0_i32, %c0_i32_0 : i32, i32
  }
  func.func @transform_13(%arg0: i32) -> (i32, i32, i32) {
    %c0_i32 = arith.constant 0 : i32
    %c0_i32_0 = arith.constant 0 : i32
    %c0_i32_1 = arith.constant 0 : i32
    return %c0_i32, %arg0, %c0_i32_0 : i32, i32, i32
  }
  func.func @transform_14(%arg0: i32) -> (i32, i32) {
    %c0_i32 = arith.constant 0 : i32
    %c0_i32_0 = arith.constant 0 : i32
    return %arg0, %c0_i32 : i32, i32
  }
}

</mosaic_0001>

<bundles_post_ra>
// kernel: vae_forward.1
= control target key start
LH: loop header
LB: loop body
LE: loop exit
PB: predicated region body
PF: predicated region fallthrough
CT: control target
= control target key end

     0   :  { %v1165_v0 = vmov 0.0|0.0   ;;  %vm1166_vm0 = vmmov 0   ;;  %v1167_v4 = vmov 0.0   ;;  %vm61_vm1 = vcmask 261120   ;;  %s1527_s1 = inlined_call_operand.vmem [shape: f32[32,128], index: 1, kind: input, shape index: {}]   ;;  %s1528_s3 = inlined_call_operand.vmem [shape: f32[128,64], index: 3, kind: input, shape index: {}]   ;;  %s1529_s0 = inlined_call_operand.vmem [shape: f32[8,32], index: 0, kind: input, shape index: {}]   ;;  %s1530_s5 = inlined_call_operand.vmem [shape: f32[64,20], index: 5, kind: input, shape index: {}]   ;;  %s1531_s2 = inlined_call_operand.vmem [shape: f32[1,128], index: 2, kind: input, shape index: {}]   ;;  %s1532_s4 = inlined_call_operand.vmem [shape: f32[1,64], index: 4, kind: input, shape index: {}]   ;;  %s1533_s6 = inlined_call_operand.vmem [shape: f32[1,20], index: 6, kind: input, shape index: {}]   ;;  %s1534_s7 = inlined_call_operand.vmem [shape: f32[10,64], index: 7, kind: input, shape index: {}]   ;;  %s1535_s9 = inlined_call_operand.vmem [shape: f32[64,128], index: 9, kind: input, shape index: {}]   ;;  %s1536_s13 = inlined_call_operand.vmem [shape: f32[10,8,10], index: 13, kind: input, shape index: {}]   ;;  %s1537_s11 = inlined_call_operand.vmem [shape: f32[128,1], index: 11, kind: input, shape index: {}]   ;;  %s1538_s8 = inlined_call_operand.vmem [shape: f32[1,64], index: 8, kind: input, shape index: {}]   ;;  %s1539_s12 = inlined_call_operand.<no memory space> [shape: f32[1,1], index: 12, kind: input, shape index: {}]   ;;  %s1540_s10 = inlined_call_operand.vmem [shape: f32[1,128], index: 10, kind: input, shape index: {}]   ;;  %s1541_s14 = inlined_call_operand.vmem [shape: f32[8,128], index: 14, kind: output, shape index: {}]  }
   0x1   :  { %1069 = vmatprep.subr.bf16.mxu0 %v1165_v0  ;;  %v50_v1 = vld [vmem:[%s1527_s1] sm:$0xff]  ;;  %v51_v2 = vld [vmem:[%s1527_s1 + $0x8] sm:$0xff]  ;;  %v52_v3 = vld [vmem:[%s1527_s1 + $0x10] sm:$0xff]  ;;  %927 = vmatprep.mubr.msk.f32.mxu0 %vm1166_vm0, %v1167_v4  ;;  %vm245_vm2 = vcmask 523264   ;;  %vm396_vm3 = vcmask 1041408   ;;  %vm1168_vm4 = vmmov 1  }
   0x2   :  { %v1070_v5 = vpack.c.bf16 %v51_v2, %v50_v1  ;;  %v53_v6 = vld [vmem:[%s1527_s1 + $0x18] sm:$0xff]  ;;  %1075 = vmatprep.subr.bf16.mxu1 %v1165_v0  ;;  %v136_v7 = vld [vmem:[%s1528_s3] sm:$0xff]  ;;  %962 = vmatprep.mubr.msk.f32.mxu1 %vm1166_vm0, %v1167_v4  ;;  %v137_v8 = vld [vmem:[%s1528_s3 + $0x8] sm:$0xff]  ;;  %vm365_vm6 = vcmask 80896   ;;  %vm803_vm7 = vcmask 162816   ;;  %vm805_vm8 = vcmask 171008  }
   0x3   :  { %v138_v9 = vld [vmem:[%s1528_s3 + $0x10] sm:$0xff]  ;;  %v139_v10 = vld [vmem:[%s1528_s3 + $0x18] sm:$0xff]  ;;  %v1073_v11 = vpack.c.bf16 %v53_v6, %v52_v3  ;;  %v1076_v12 = vpack.c.bf16 %v137_v8, %v136_v7  ;;  %v140_v14 = vld [vmem:[%s1528_s3 + $0x20] sm:$0xff] }
   0x4   :  { %1071 = vmatpush3.bf16.msra.mxu0 %v1070_v5  ;;  %v1079_v13 = vpack.c.bf16 %v139_v10, %v138_v9  ;;  %v141_v15 = vld [vmem:[%s1528_s3 + $0x28] sm:$0xff]  ;;  %v49_v16 = vld [vmem:[%s1529_s0] sm:$0xff]  ;;  %v142_v18 = vld [vmem:[%s1528_s3 + $0x30] sm:$0xff] }
   0x5   :  { %1072 = vmatprep.subr.bf16.mxu0 %v1165_v0  ;;  %1077 = vmatpush3.bf16.msra.mxu1 %v1076_v12  ;;  %v1082_v17 = vpack.c.bf16 %v141_v15, %v140_v14  ;;  %v143_v19 = vld [vmem:[%s1528_s3 + $0x38] sm:$0xff]  ;;  %v144_v21 = vld [vmem:[%s1528_s3 + $0x40] sm:$0xff]  ;;  %v145_v22 = vld [vmem:[%s1528_s3 + $0x48] sm:$0xff] }
   0x6   :  { %1078 = vmatprep.subr.bf16.mxu1 %v1165_v0  ;;  %v1085_v20 = vpack.c.bf16 %v143_v19, %v142_v18  ;;  %v1088_v23 = vpack.c.bf16 %v145_v22, %v144_v21  ;;  %v146_v24 = vld [vmem:[%s1528_s3 + $0x50] sm:$0xff]  ;;  %v147_v25 = vld [vmem:[%s1528_s3 + $0x58] sm:$0xff]  ;;  %v148_v27 = vld [vmem:[%s1528_s3 + $0x60] sm:$0xff] }
   0x7   :  { %v1091_v26 = vpack.c.bf16 %v147_v25, %v146_v24  ;;  %v149_v28 = vld [vmem:[%s1528_s3 + $0x68] sm:$0xff]  ;;  %v150_v30 = vld [vmem:[%s1528_s3 + $0x70] sm:$0xff]  ;;  %v151_v31 = vld [vmem:[%s1528_s3 + $0x78] sm:$0xff] }
   0x8   :  { %1074 = vmatpush3.bf16.msra.mxu0 %v1073_v11  ;;  %v1094_v29 = vpack.c.bf16 %v149_v28, %v148_v27  ;;  %v1097_v32 = vpack.c.bf16 %v151_v31, %v150_v30  ;;  %v230_v33 = vld [vmem:[%s1530_s5] sm:$0xff]  ;;  %v231_v34 = vld [vmem:[%s1530_s5 + $0x8] sm:$0xff]  ;;  %v232_v35 = vld [vmem:[%s1530_s5 + $0x10] sm:$0xff] }
   0x9   :  { %1099 = vmatprep.subr.bf16.mxu0 %v1165_v0  ;;  %1080 = vmatpush3.bf16.msra.mxu1 %v1079_v13  ;;  %v1100_v36 = vpack.c.bf16 %v231_v34, %v230_v33  ;;  %v233_v37 = vld [vmem:[%s1530_s5 + $0x18] sm:$0xff]  ;;  %v234_v39 = vld [vmem:[%s1530_s5 + $0x20] sm:$0xff]  ;;  %v235_v40 = vld [vmem:[%s1530_s5 + $0x28] sm:$0xff] }
   0xa   :  { %1081 = vmatprep.subr.bf16.mxu1 %v1165_v0  ;;  %v1103_v38 = vpack.c.bf16 %v233_v37, %v232_v35  ;;  %v1106_v41 = vpack.c.bf16 %v235_v40, %v234_v39  ;;  %v812_v42 = vld [vmem:[%s1531_s2] ss:$0 sm:$0xff]  ;;  %v236_v47 = vld [vmem:[%s1530_s5 + $0x30] sm:$0xff]  ;;  %v237_v48 = vld [vmem:[%s1530_s5 + $0x38] sm:$0xff] }
   0xb   :  { %928 = vmatmul.mubr.msk.f32.vlgmr.msra.gmra.mrb[0].mxu0 %vm61_vm1, %v49_v16  ;;  %v1109_v49 = vpack.c.bf16 %v237_v48, %v236_v47  ;;  %v814_v50 = vld [vmem:[%s1532_s4] ss:$0 sm:$0xff]  ;;  %v357_v61 = vld [vmem:[%s1534_s7 + $0x8] sm:$0x3]  ;;  %vm1112_vm5 = vmpackc.low %vm396_vm3, %vm1168_vm4 }
   0xc   :  { %981 = vmatprep.mubr.msk.f32.mxu0 %vm1166_vm0, %v1167_v4  ;;  %1101 = vmatpush3.bf16.msra.mxu0 %v1100_v36  ;;  %v815_v55 = vld [vmem:[%s1533_s6] ss:$0 sm:$0xff]  ;;  %s1169_s6 = smov 118   ;;  %v526_v3 = vld [vmem:[%s1535_s9 + $0x8] sm:$0xff]  ;;  %v324_v7 = vld [vmem:[%s1536_s13 + $0x10] sm:$0xff] }
   0xd   :  { %1083 = vmatpush3.bf16.msra.mxu1 %v1082_v17  ;;  %1102 = vmatprep.subr.bf16.mxu0 %v1165_v0  ;;  %v356_v60 = vld [vmem:[%s1534_s7] sm:$0xff]  ;;  %v323_v6 = vld [vmem:[%s1536_s13 + $0x8] sm:$0xff]  ;;  %v325_v12 = vld [vmem:[%s1536_s13 + $0x18] sm:$0xff] }
   0xe   :  { %1084 = vmatprep.subr.bf16.mxu1 %v1165_v0  ;;  %v1111_v62 = vpack.c.bf16 %v357_v61, %v356_v60  ;;  %v525_v2 = vld [vmem:[%s1535_s9] sm:$0xff]  ;;  %v527_v13 = vld [vmem:[%s1535_s9 + $0x10] sm:$0xff]  ;;  %v528_v14 = vld [vmem:[%s1535_s9 + $0x18] sm:$0xff] }
   0xf   :  { %v322_v5 = vld [vmem:[%s1536_s13] sm:$0xff]  ;;  %v1121_v19 = vpack.c.bf16 %v528_v14, %v527_v13  ;;  %v327_v22 = vld [vmem:[%s1536_s13 + $0x28] sm:$0xff]  ;;  %v328_v25 = vld [vmem:[%s1536_s13 + $0x30] sm:$0xff] }
  0x10   :  { %1104 = vmatpush3.bf16.msra.mxu0 %v1103_v38  ;;  %v326_v15 = vld [vmem:[%s1536_s13 + $0x20] sm:$0xff]  ;;  %v530_v24 = vld [vmem:[%s1535_s9 + $0x28] sm:$0xff]  ;;  %v329_v31 = vld [vmem:[%s1536_s13 + $0x38] sm:$0xff] }
  0x11   :  { %1086 = vmatpush3.bf16.msra.mxu1 %v1085_v20  ;;  %1105 = vmatprep.subr.bf16.mxu0 %v1165_v0  ;;  %v331_v37 = vld [vmem:[%s1536_s13 + $0x48] sm:$0xff]  ;;  %v706_v47 = vld [vmem:[%s1537_s11 + $0x10] sm:$0xff] }
  0x12   :  { %1087 = vmatprep.subr.bf16.mxu1 %v1165_v0 }
  0x14   :  { %1107 = vmatpush3.bf16.msra.mxu0 %v1106_v41 }
  0x15   :  { %1089 = vmatpush3.bf16.msra.mxu1 %v1088_v23  ;;  %1108 = vmatprep.subr.bf16.mxu0 %v1165_v0  ;;  %v529_v23 = vld [vmem:[%s1535_s9 + $0x20] sm:$0xff] }
  0x16   :  { %1090 = vmatprep.subr.bf16.mxu1 %v1165_v0  ;;  %v1125_v28 = vpack.c.bf16 %v530_v24, %v529_v23  ;;  %v710_v23 = vld [vmem:[%s1537_s11 + $0x30] sm:$0xff]  ;;  %v711_v24 = vld [vmem:[%s1537_s11 + $0x38] sm:$0xff] }
  0x18   :  { %1110 = vmatpush3.bf16.msra.mxu0 %v1109_v49  ;;  %v707_v49 = vld [vmem:[%s1537_s11 + $0x18] sm:$0xff] }
  0x19   :  { %1092 = vmatpush3.bf16.msra.mxu1 %v1091_v26  ;;  %1113 = vmatprep.subr.msk.bf16.mxu0 %vm1112_vm5, %v1111_v62 }
  0x1a   :  { %1093 = vmatprep.subr.bf16.mxu1 %v1165_v0 }
  0x1d   :  { %1095 = vmatpush3.bf16.msra.mxu1 %v1094_v29 }
  0x1e   :  { %1096 = vmatprep.subr.bf16.mxu1 %v1165_v0 }
  0x21   :  { %1098 = vmatpush3.bf16.msra.mxu1 %v1097_v32  ;;  %v330_v32 = vld [vmem:[%s1536_s13 + $0x40] sm:$0xff] }
  0x22   :  { %1133 = vmatprep.subr.bf16.mxu1 %v1165_v0 }
  0xde   :  { %v131_v43 = vpop.f32.mrb[0].mxu0 }
  0xdf   :  { %v132_v44 = vadd.f32 %v812_v42, %v131_v43  ;;  %v929_v45 = vpop.f32.mrb[1].mxu0  ;;  %v531_v42 = vld [vmem:[%s1535_s9 + $0x30] sm:$0xff]  ;;  %v532_v43 = vld [vmem:[%s1535_s9 + $0x38] sm:$0xff] }
  0xe0   :  { %v704_v45 = vld [vmem:[%s1537_s11] sm:$0xff] }
  0xe1   :  { %v135_v46 = vmax.f32 %v132_v44, 0.0  ;;  %v1129_v44 = vpack.c.bf16 %v532_v43, %v531_v42 }
  0xe3   :  { %963 = vmatmul.mubr.f32.vlgmr.msra.gmra.mrb[0].mxu1 %v135_v46  ;;  %v705_v46 = vld [vmem:[%s1537_s11 + $0x8] sm:$0xff] }
  0xe4   :  { %1066 = vmatprep.mubr.msk.f32.mxu1 %vm1166_vm0, %v1167_v4  ;;  %v1117_v4 = vpack.c.bf16 %v526_v3, %v525_v2  ;;  %v1134_v48 = vpack.c.bf16 %v705_v46, %v704_v45 }
  0xe6   :  { %1135 = vmatpush3.bf16.msra.mxu1 %v1134_v48 }
  0xe7   :  { %1136 = vmatprep.subr.bf16.mxu1 %v1165_v0 }
 0x1b6   :  { %v225_v51 = vpop.f32.mrb[0].mxu1 }
 0x1b7   :  { %v226_v52 = vadd.f32 %v814_v50, %v225_v51  ;;  %v964_v53 = vpop.f32.mrb[1].mxu1  ;;  %v1137_v50 = vpack.c.bf16 %v707_v49, %v706_v47  ;;  %v817_v51 = vld [vmem:[%s1538_s8] ss:$0 sm:$0xff] }
 0x1b9   :  { %v229_v54 = vmax.f32 %v226_v52, 0.0  ;;  %1138 = vmatpush3.bf16.msra.mxu1 %v1137_v50 }
 0x1ba   :  { %1139 = vmatprep.subr.bf16.mxu1 %v1165_v0 }
 0x1bb   :  { %982 = vmatmul.mubr.msk.f32.vlgmr.msra.gmra.mrb[2].mxu0 %vm245_vm2, %v229_v54 }
 0x1bc   :  { %1116 = vmatpush3.bf16.msk.msra.mxu0 %vm1112_vm5, %v1111_v62 }
 0x1bd   :  { %1118 = vmatprep.subr.bf16.mxu0 %v1117_v4 }
 0x28e   :  { %v315_v56 = vpop.f32.mrb[2].mxu0 }
 0x28f   :  { %v1366_v57 = vadd.f32 %v815_v55, %v315_v56  ;;  %v983_v58 = vpop.f32.mrb[3].mxu0 }
 0x291   :  { %v319_v59 = vmul.f32 0.5, %v1366_v57 }
 0x293   :  { %v320_v63 = vmul.f32 1.442695, %v319_v59 }
 0x295   :  { %1163 = vpow2.f32 %v320_v63 }
 0x29f   :  { %v1164_v1 = vpop.eup %1163 }
 0x2a0   :  { %333 = vrot.lane.b32.xlu0 %v1164_v1, %s1169_s6 }
 0x312   :  { %v334_v8 = vpop.permute.xlu0 %333 }
 0x313   :  { %v336_v9 = vmul.f32 %v334_v8, %v322_v5  ;;  %v337_v10 = vmul.f32 %v334_v8, %v323_v6  ;;  %v338_v11 = vmul.f32 %v334_v8, %v324_v7  ;;  %v339_v18 = vmul.f32 %v334_v8, %v325_v12 }
 0x314   :  { %v340_v21 = vmul.f32 %v334_v8, %v326_v15  ;;  %v341_v27 = vmul.f32 %v334_v8, %v327_v22  ;;  %v342_v30 = vmul.f32 %v334_v8, %v328_v25  ;;  %v343_v34 = vmul.f32 %v334_v8, %v329_v31 }
 0x315   :  { %v346_v16 = vadd.f32 %v336_v9, %v1366_v57  ;;  %v347_v17 = vadd.f32 %v337_v10, %v1366_v57  ;;  %v348_v20 = vadd.f32 %v338_v11, %v1366_v57  ;;  %v349_v26 = vadd.f32 %v339_v18, %v1366_v57 }
 0x316   :  { %v350_v29 = vadd.f32 %v340_v21, %v1366_v57  ;;  %v351_v33 = vadd.f32 %v341_v27, %v1366_v57  ;;  %v352_v35 = vadd.f32 %v342_v30, %v1366_v57  ;;  %v344_v36 = vmul.f32 %v334_v8, %v330_v32  ;;  %v709_v21 = vld [vmem:[%s1537_s11 + $0x28] sm:$0xff]  ;;  %v715_v30 = vld [vmem:[%s1537_s11 + $0x58] sm:$0xff]  ;;  %v716_v32 = vld [vmem:[%s1537_s11 + $0x60] sm:$0xff] }
 0x317   :  { %988 = vmatprep.mubr.msk.f32.mxu0 %vm365_vm6, %v346_v16  ;;  %v353_v38 = vadd.f32 %v343_v34, %v1366_v57  ;;  %v345_v39 = vmul.f32 %v334_v8, %v331_v37  ;;  %v1143_v25 = vpack.c.bf16 %v711_v24, %v710_v23  ;;  %v713_v27 = vld [vmem:[%s1537_s11 + $0x48] sm:$0xff] }
 0x318   :  { %989 = vmatmul.mubr.msk.f32.vlgmr.msra.gmra.mrb[4].mxu0 %vm365_vm6, %v347_v17  ;;  %v354_v40 = vadd.f32 %v344_v36, %v1366_v57  ;;  %v719_v36 = vld [vmem:[%s1537_s11 + $0x78] sm:$0xff] }
 0x319   :  { %991 = vmatprep.mubr.msk.f32.mxu0 %vm365_vm6, %v348_v20  ;;  %1120 = vmatpush3.bf16.msra.mxu0 %v1117_v4  ;;  %v355_v41 = vadd.f32 %v345_v39, %v1366_v57  ;;  %v708_v20 = vld [vmem:[%s1537_s11 + $0x20] sm:$0xff] }
 0x31a   :  { %1122 = vmatprep.subr.bf16.mxu0 %v1121_v19  ;;  %v1140_v22 = vpack.c.bf16 %v709_v21, %v708_v20  ;;  %v829_v39 = vld [vmem:[%s1540_s10] ss:$0 sm:$0xff]  ;;  %s1170_s10 = smov 20  }
 0x31c   :  { %992 = vmatmul.mubr.msk.f32.gmra.mrb[6].mxu0 %vm365_vm6, %v349_v26  ;;  %1141 = vmatpush3.bf16.msra.mxu1 %v1140_v22  ;;  %v712_v26 = vld [vmem:[%s1537_s11 + $0x40] sm:$0xff] }
 0x31d   :  { %994 = vmatprep.mubr.msk.f32.mxu0 %vm365_vm6, %v350_v29  ;;  %1124 = vmatpush3.bf16.msra.mxu0 %v1121_v19  ;;  %v714_v29 = vld [vmem:[%s1537_s11 + $0x50] sm:$0xff] }
 0x31e   :  { %1126 = vmatprep.subr.bf16.mxu0 %v1125_v28  ;;  %1142 = vmatprep.subr.bf16.mxu1 %v1165_v0  ;;  %v1149_v31 = vpack.c.bf16 %v715_v30, %v714_v29 }
 0x320   :  { %995 = vmatmul.mubr.msk.f32.gmra.mrb[8].mxu0 %vm365_vm6, %v351_v33  ;;  %1144 = vmatpush3.bf16.msra.mxu1 %v1143_v25  ;;  %v717_v33 = vld [vmem:[%s1537_s11 + $0x68] sm:$0xff] }
 0x321   :  { %997 = vmatprep.mubr.msk.f32.mxu0 %vm365_vm6, %v352_v35  ;;  %1128 = vmatpush3.bf16.msra.mxu0 %v1125_v28  ;;  %v1146_v28 = vpack.c.bf16 %v713_v27, %v712_v26  ;;  %v1152_v34 = vpack.c.bf16 %v717_v33, %v716_v32  ;;  %v718_v35 = vld [vmem:[%s1537_s11 + $0x70] sm:$0xff] }
 0x322   :  { %1130 = vmatprep.subr.bf16.mxu0 %v1129_v44  ;;  %1145 = vmatprep.subr.bf16.mxu1 %v1165_v0  ;;  %v1155_v37 = vpack.c.bf16 %v719_v36, %v718_v35 }
 0x324   :  { %998 = vmatmul.mubr.msk.f32.gmra.mrb[10].mxu0 %vm365_vm6, %v353_v38  ;;  %1147 = vmatpush3.bf16.msra.mxu1 %v1146_v28  ;;  %v19_v38 = vstv %s1539_s12 }
 0x325   :  { %1000 = vmatprep.mubr.msk.f32.mxu0 %vm365_vm6, %v354_v40  ;;  %1132 = vmatpush3.bf16.msra.mxu0 %v1129_v44  ;;  %20 = vst [vmem:[#allocation2] sm:$0x1] %v19_v38 }
 0x326   :  { %1148 = vmatprep.subr.bf16.mxu1 %v1165_v0 }
 0x328   :  { %1001 = vmatmul.mubr.msk.f32.gmra.mrb[12].mxu0 %vm365_vm6, %v355_v41  ;;  %1150 = vmatpush3.bf16.msra.mxu1 %v1149_v31 }
 0x329   :  { %1151 = vmatprep.subr.bf16.mxu1 %v1165_v0 }
 0x32c   :  { %1153 = vmatpush3.bf16.msra.mxu1 %v1152_v34 }
 0x32d   :  { %1154 = vmatprep.subr.bf16.mxu1 %v1165_v0 }
 0x330   :  { %1156 = vmatpush3.bf16.msra.mxu1 %v1155_v37 }
 0x3eb   :  { %v990_v52 = vpop.f32.mrb[4].mxu0 }
 0x3ec   :  { %v472_v53 = vadd.f32 %v990_v52, %v817_v51  ;;  %v466_v54 = vpop.f32.mrb[5].mxu0 }
 0x3ed   :  { %v467_v55 = vadd.f32 %v817_v51, %v466_v54 }
 0x3ee   :  { %v516_v59 = vmax.f32 %v472_v53, 0.0 }
 0x3ef   :  { %v515_v56 = vmax.f32 %v467_v55, 0.0  ;;  %v993_v58 = vpop.f32.mrb[6].mxu0 }
 0x3f0   :  { %v482_v60 = vadd.f32 %v993_v58, %v817_v51  ;;  %v476_v61 = vpop.f32.mrb[7].mxu0 }
 0x3f1   :  { %v477_v62 = vadd.f32 %v817_v51, %v476_v61  ;;  %1019 = vmatprep.mubr.msk.f32.mxu0 %vm245_vm2, %v515_v56 }
 0x3f2   :  { %1020 = vmatmul.mubr.msk.f32.vlgmr.msra.gmra.mrb[14].mxu0 %vm245_vm2, %v516_v59  ;;  %v518_v2 = vmax.f32 %v482_v60, 0.0 }
 0x3f3   :  { %v517_v63 = vmax.f32 %v477_v62, 0.0  ;;  %v996_v1 = vpop.f32.mrb[8].mxu0 }
 0x3f4   :  { %v492_v3 = vadd.f32 %v996_v1, %v817_v51  ;;  %v486_v4 = vpop.f32.mrb[9].mxu0 }
 0x3f5   :  { %v487_v5 = vadd.f32 %v817_v51, %v486_v4  ;;  %1022 = vmatprep.mubr.msk.f32.mxu0 %vm245_vm2, %v517_v63 }
 0x3f6   :  { %1023 = vmatmul.mubr.msk.f32.gmra.mrb[16].mxu0 %vm245_vm2, %v518_v2  ;;  %v520_v8 = vmax.f32 %v492_v3, 0.0 }
 0x3f7   :  { %v519_v6 = vmax.f32 %v487_v5, 0.0  ;;  %v999_v7 = vpop.f32.mrb[10].mxu0 }
 0x3f8   :  { %v502_v9 = vadd.f32 %v999_v7, %v817_v51  ;;  %v496_v10 = vpop.f32.mrb[11].mxu0 }
 0x3f9   :  { %v497_v11 = vadd.f32 %v817_v51, %v496_v10  ;;  %1025 = vmatprep.mubr.msk.f32.mxu0 %vm245_vm2, %v519_v6 }
 0x3fa   :  { %1026 = vmatmul.mubr.msk.f32.gmra.mrb[18].mxu0 %vm245_vm2, %v520_v8  ;;  %v522_v14 = vmax.f32 %v502_v9, 0.0 }
 0x3fb   :  { %v521_v12 = vmax.f32 %v497_v11, 0.0  ;;  %v1002_v13 = vpop.f32.mrb[12].mxu0 }
 0x3fc   :  { %v512_v15 = vadd.f32 %v1002_v13, %v817_v51  ;;  %v506_v16 = vpop.f32.mrb[13].mxu0 }
 0x3fd   :  { %v507_v17 = vadd.f32 %v817_v51, %v506_v16  ;;  %1028 = vmatprep.mubr.msk.f32.mxu0 %vm245_vm2, %v521_v12 }
 0x3fe   :  { %1029 = vmatmul.mubr.msk.f32.gmra.mrb[20].mxu0 %vm245_vm2, %v522_v14  ;;  %v524_v19 = vmax.f32 %v512_v15, 0.0 }
 0x3ff   :  { %v523_v18 = vmax.f32 %v507_v17, 0.0  ;;  %v840_v17 = vld [vmem:[#allocation2] ss:$0 sm:$0xff] }
 0x401   :  { %1031 = vmatprep.mubr.msk.f32.mxu0 %vm245_vm2, %v523_v18 }
 0x402   :  { %1032 = vmatmul.mubr.msk.f32.gmra.mrb[22].mxu0 %vm245_vm2, %v524_v19 }
 0x4c5   :  { %v1021_v0 = vpop.f32.mrb[14].mxu0 }
 0x4c6   :  { %v642_v40 = vadd.f32 %v1021_v0, %v829_v39  ;;  %v636_v41 = vpop.f32.mrb[15].mxu0 }
 0x4c7   :  { %v637_v42 = vadd.f32 %v829_v39, %v636_v41 }
 0x4c8   :  { %v686_v43 = vmax.f32 %v642_v40, 0.0 }
 0x4c9   :  { %v685_v44 = vmax.f32 %v637_v42, 0.0  ;;  %v1024_v45 = vpop.f32.mrb[16].mxu0 }
 0x4ca   :  { %v646_v46 = vpop.f32.mrb[17].mxu0  ;;  %v652_v48 = vadd.f32 %v1024_v45, %v829_v39 }
 0x4cb   :  { %v695_v47 = vadd.f32 %v686_v43, %v685_v44  ;;  %v647_v49 = vadd.f32 %v829_v39, %v646_v46 }
 0x4cc   :  { %v688_v53 = vmax.f32 %v652_v48, 0.0 }
 0x4cd   :  { %v687_v50 = vmax.f32 %v647_v49, 0.0  ;;  %v1027_v51 = vpop.f32.mrb[18].mxu0 }
 0x4ce   :  { %v656_v52 = vpop.f32.mrb[19].mxu0  ;;  %v662_v55 = vadd.f32 %v1027_v51, %v829_v39 }
 0x4cf   :  { %v696_v54 = vadd.f32 %v695_v47, %v687_v50  ;;  %v657_v56 = vadd.f32 %v829_v39, %v656_v52 }
 0x4d0   :  { %v690_v62 = vmax.f32 %v662_v55, 0.0 }
 0x4d1   :  { %v689_v58 = vmax.f32 %v657_v56, 0.0  ;;  %v697_v59 = vadd.f32 %v696_v54, %v688_v53  ;;  %v1030_v60 = vpop.f32.mrb[20].mxu0 }
 0x4d2   :  { %v666_v61 = vpop.f32.mrb[21].mxu0  ;;  %v672_v1 = vadd.f32 %v1030_v60, %v829_v39 }
 0x4d3   :  { %v698_v63 = vadd.f32 %v697_v59, %v689_v58  ;;  %v667_v2 = vadd.f32 %v829_v39, %v666_v61 }
 0x4d4   :  { %v692_v7 = vmax.f32 %v672_v1, 0.0 }
 0x4d5   :  { %v691_v3 = vmax.f32 %v667_v2, 0.0  ;;  %v699_v4 = vadd.f32 %v698_v63, %v690_v62  ;;  %v1033_v5 = vpop.f32.mrb[22].mxu0 }
 0x4d6   :  { %v676_v6 = vpop.f32.mrb[23].mxu0  ;;  %v682_v9 = vadd.f32 %v1033_v5, %v829_v39 }
 0x4d7   :  { %v700_v8 = vadd.f32 %v699_v4, %v691_v3  ;;  %v677_v10 = vadd.f32 %v829_v39, %v676_v6 }
 0x4d8   :  { %v694_v13 = vmax.f32 %v682_v9, 0.0 }
 0x4d9   :  { %v693_v11 = vmax.f32 %v677_v10, 0.0  ;;  %v701_v12 = vadd.f32 %v700_v8, %v692_v7 }
 0x4db   :  { %v702_v14 = vadd.f32 %v701_v12, %v693_v11 }
 0x4dd   :  { %v703_v15 = vadd.f32 %v702_v14, %v694_v13 }
 0x4df   :  { %1067 = vmatmul.mubr.f32.vlgmr.msra.gmra.mrb[2].mxu1 %v703_v15 }
 0x5b2   :  { %v786_v16 = vpop.f32.mrb[2].mxu1 }
 0x5b3   :  { %v790_v18 = vmul.f32 0.1, %v786_v16  ;;  %v1068_v19 = vpop.f32.mrb[3].mxu1 }
 0x5b5   :  { %v798_v20 = vadd.f32 %v840_v17, %v790_v18 }
 0x5b7   :  { %800 = vrot.lane.b32.xlu0 %v798_v20, %s1170_s10 }
 0x629   :  { %v801_v21 = vpop.permute.xlu0 %800 }
 0x62a   :  { %v804_v22 = vsel %vm803_vm7, %v1366_v57, %v801_v21 }
 0x62b   :  { %v806_v23 = vsel %vm805_vm8, %v804_v22, 0.0 }
 0x62c   :  { %807 = vst [vmem:[%s1541_s14] sm:$0xff] %v806_v23 }

</bundles_post_ra>
